<compile_context>
chip_gen: v5e
topology: v5e:2x2
jax: 0.10.0
libtpu: 0.0.40
codegen_flags: <defaults>
</compile_context>

<pallas_src>
import jax
import jax.numpy as jnp
from jax.experimental import pallas as pl
from jax.experimental.pallas import tpu as pltpu


def se_kernel(x_ref, w1_ref, w2_ref, b1_ref, b2_ref, o_ref):
    # x_ref block: (Nb, C, HW) — native NCHW view (HW on lanes, C on sublanes).
    hw = x_ref.shape[-1]
    # Squeeze: global average pool over the spatial (lane) axis, f32 accumulate.
    pooled = jnp.sum(x_ref[...], axis=-1, dtype=jnp.float32) * (1.0 / hw)   # (Nb, C)
    # fc1 (1x1 conv, no bias) with bn1 scale folded into the weight; + shift + ReLU.
    z1 = jnp.dot(pooled, w1_ref[...], preferred_element_type=jnp.float32)   # (Nb, Cr)
    h = jnp.maximum(z1 + b1_ref[...], 0.0)                                  # (Nb, Cr)
    # fc2 (1x1 conv, no bias) with bn2 scale folded in; + shift + sigmoid.
    z2 = jnp.dot(h, w2_ref[...], preferred_element_type=jnp.float32)        # (Nb, C)
    gate = jax.nn.sigmoid(z2 + b2_ref[...])                                 # (Nb, C)
    # Excitation: per-channel rescale in the input's native dtype,
    # gate broadcast along the lane/HW axis.
    o_ref[...] = x_ref[...] * gate.astype(o_ref.dtype)[:, :, None]


def _vmem_capacity_bytes():
    """Physical VMEM per TensorCore; conservative fallback if unqueryable."""
    try:
        cap = getattr(pltpu.get_tpu_info(), "vmem_capacity_bytes", None)
        if cap:
            return int(cap)
    except Exception:
        pass
    return 64 * 2**20   # v7x per-TC capacity == smallest current generation


def se_module(x, w1, w2, scale1, shift1, scale2, shift2, *, batch_tile=None):
    """SE forward. x: (N, C, H, W). w1: (Cr, C), w2: (C, Cr).
    scale*/shift*: folded eval-mode BN per-channel vectors (1-D)."""
    N, C, H, W = x.shape
    Cr = w1.shape[0]
    HW = H * W
    itemsize = jnp.dtype(x.dtype).itemsize

    # Native-layout view: (N, C, HW). Free reshape — no transpose, no HBM pass.
    x_flat = x.reshape(N, C, HW)

    # Fold BN scale into the conv weights; transpose for (in, out) matmuls.
    w1f = (scale1[:, None] * w1).T.astype(jnp.float32)        # (C, Cr)
    w2f = (scale2[:, None] * w2).T.astype(jnp.float32)        # (Cr, C)
    b1 = shift1.reshape(1, Cr).astype(jnp.float32)            # lane-dense rows
    b2 = shift2.reshape(1, C).astype(jnp.float32)

    # ---- batch-tile selection (generation-aware) ---------------------------
    vmem_cap = _vmem_capacity_bytes()
    vmem_budget = (vmem_cap * 7) // 10          # ~45 MiB on v7x, ~90 MiB v5e/v6e
    per_sample = C * HW * itemsize              # one sample's block bytes
    # Double-buffered input + output blocks per grid step -> 4x per sample.
    max_nb = max(1, int(vmem_budget // (4 * per_sample)))

    if batch_tile is not None:
        Nb = max(1, min(int(batch_tile), N))
    else:
        steps = pl.cdiv(N, max_nb)              # what VMEM forces
        if N > 1 and steps < 2:
            steps = 2                           # give both v7x TensorCores work
        if steps % 2 == 1 and steps < N:
            steps += 1                          # even step count -> balanced TCs
        steps = max(1, min(steps, N))
        Nb = pl.cdiv(N, steps)
    grid = pl.cdiv(N, Nb)                       # ragged last block allowed

    block_bytes = Nb * per_sample
    vmem_limit = int(min(vmem_cap - 8 * 2**20,
                         max(32 * 2**20, 5 * block_bytes)))

    # Purely HBM-bound: read + write of x dominates; FLOPs/transcendentals tiny.
    cost = pl.CostEstimate(
        flops=int(4 * N * C * Cr + 2 * N * C * HW),
        transcendentals=int(N * C),
        bytes_accessed=int(2 * N * C * HW * itemsize + (2 * C * Cr + C + Cr) * 4),
    )

    out = pl.pallas_call(
        se_kernel,
        out_shape=jax.ShapeDtypeStruct((N, C, HW), x.dtype),
        grid_spec=pltpu.PrefetchScalarGridSpec(
            num_scalar_prefetch=0,
            grid=(grid,),
            in_specs=[
                pl.BlockSpec((Nb, C, HW), lambda n: (n, 0, 0)),  # x (batch tile)
                pl.BlockSpec((C, Cr), lambda n: (0, 0)),         # w1 (BN folded)
                pl.BlockSpec((Cr, C), lambda n: (0, 0)),         # w2 (BN folded)
                pl.BlockSpec((1, Cr), lambda n: (0, 0)),         # bn1 shift
                pl.BlockSpec((1, C), lambda n: (0, 0)),          # bn2 shift
            ],
            out_specs=pl.BlockSpec((Nb, C, HW), lambda n: (n, 0, 0)),
        ),
        compiler_params=pltpu.CompilerParams(
            dimension_semantics=("parallel",),
            vmem_limit_bytes=vmem_limit),
        cost_estimate=cost,
    )(x_flat, w1f, w2f, b1, b2)

    return out.reshape(N, C, H, W)


def reference_se(x, w1, w2, scale1, shift1, scale2, shift2):
    pooled = jnp.mean(x, axis=(2, 3))                              # (N, C)
    z1 = jnp.dot(pooled, w1.T, precision=jax.lax.Precision.HIGHEST)
    h = jnp.maximum(z1 * scale1 + shift1, 0.0)                     # (N, Cr)
    z2 = jnp.dot(h, w2.T, precision=jax.lax.Precision.HIGHEST)
    gate = jax.nn.sigmoid(z2 * scale2 + shift2)                    # (N, C)
    return x * gate[:, :, None, None]


def make_params(key, C, reduction, eps=1e-5):
    Cr = C // reduction
    k1, k2, kg1, kb1, km1, kv1, kg2, kb2, km2, kv2 = jax.random.split(key, 10)
    # fc1: Conv2d(C, Cr, 1, bias=False)  -> weight (Cr, C, 1, 1) -> (Cr, C)
    w1 = jax.random.normal(k1, (Cr, C), dtype=jnp.float32) * 0.1
    # fc2: Conv2d(Cr, C, 1, bias=False)  -> weight (C, Cr, 1, 1) -> (C, Cr)
    w2 = jax.random.normal(k2, (C, Cr), dtype=jnp.float32) * 0.1
    # Non-trivial eval-mode BN stats so the folding is actually exercised.
    gamma1 = 1.0 + 0.1 * jax.random.normal(kg1, (Cr,), dtype=jnp.float32)
    beta1 = 0.1 * jax.random.normal(kb1, (Cr,), dtype=jnp.float32)
    rmean1 = 0.1 * jax.random.normal(km1, (Cr,), dtype=jnp.float32)
    rvar1 = jax.random.uniform(kv1, (Cr,), minval=0.5, maxval=1.5)
    gamma2 = 1.0 + 0.1 * jax.random.normal(kg2, (C,), dtype=jnp.float32)
    beta2 = 0.1 * jax.random.normal(kb2, (C,), dtype=jnp.float32)
    rmean2 = 0.1 * jax.random.normal(km2, (C,), dtype=jnp.float32)
    rvar2 = jax.random.uniform(kv2, (C,), minval=0.5, maxval=1.5)
    scale1 = gamma1 / jnp.sqrt(rvar1 + eps)
    shift1 = beta1 - rmean1 * scale1
    scale2 = gamma2 / jnp.sqrt(rvar2 + eps)
    shift2 = beta2 - rmean2 * scale2
    return w1, w2, scale1, shift1, scale2, shift2


if __name__ == "__main__":
    se_fn = jax.jit(se_module, static_argnames=("batch_tile",))

    key = jax.random.PRNGKey(0)
    kx1, kp1, kx2, kp2, kx3, kp3 = jax.random.split(key, 6)

    # 1) Small spec-sized test: N=2, C=4, 16x16, reduction=2 (lane-dense HW=256).
    N, C, H, W, red = 2, 4, 16, 16, 2
    x = jax.random.normal(kx1, (N, C, H, W), dtype=jnp.float32)
    params = make_params(kp1, C, red)
    out = jax.block_until_ready(se_fn(x, *params))
    ref = reference_se(x, *params)
    assert out.shape == (N, C, H, W)
    assert jnp.allclose(out, ref, atol=1e-4, rtol=1e-4), \
        float(jnp.max(jnp.abs(out - ref)))

    # 2) Production-like stage: C=128, 14x14 (HW=196 -> masked lane tail, still
    #    far cheaper than the removed full-tensor transpose passes).
    N2, C2, H2, W2, red2 = 2, 128, 14, 14, 8
    x2 = jax.random.normal(kx2, (N2, C2, H2, W2), dtype=jnp.float32)
    params2 = make_params(kp2, C2, red2)
    out2 = jax.block_until_ready(se_fn(x2, *params2))
    ref2 = reference_se(x2, *params2)
    assert out2.shape == (N2, C2, H2, W2)
    assert jnp.allclose(out2, ref2, atol=1e-4, rtol=1e-4), \
        float(jnp.max(jnp.abs(out2 - ref2)))

    # 3) Ragged batch tiling (N=3 with a forced tile of 2 -> masked last block)
    #    plus the bf16 native-dtype rescale/store path.
    N3, C3, H3, W3, red3 = 3, 64, 16, 16, 4
    x3 = jax.random.normal(kx3, (N3, C3, H3, W3),
                           dtype=jnp.float32).astype(jnp.bfloat16)
    params3 = make_params(kp3, C3, red3)
    out3 = jax.block_until_ready(se_fn(x3, *params3, batch_tile=2))
    ref3 = reference_se(x3.astype(jnp.float32), *params3)
    assert out3.shape == (N3, C3, H3, W3)
    assert out3.dtype == jnp.bfloat16
    err3 = jnp.max(jnp.abs(out3.astype(jnp.float32) - ref3))
    assert jnp.allclose(out3.astype(jnp.float32), ref3, atol=3e-2, rtol=3e-2), \
        float(err3)

    print("KERNEL_OK")
</pallas_src>

<mosaic_0001>
module attributes {stable_mosaic.version = 11 : i64} {
  func.func @se_kernel(%arg0: i32, %arg1: memref<1x4x256xf32, #tpu.memory_space<vmem>>, %arg2: memref<4x2xf32, #tpu.memory_space<vmem>>, %arg3: memref<2x4xf32, #tpu.memory_space<vmem>>, %arg4: memref<1x2xf32, #tpu.memory_space<vmem>>, %arg5: memref<1x4xf32, #tpu.memory_space<vmem>>, %arg6: memref<1x4x256xf32, #tpu.memory_space<vmem>>) attributes {dimension_semantics = [#tpu.dimension_semantics<parallel>], iteration_bounds = array<i64: 2>, scalar_prefetch = 0 : i64, scratch_operands = 0 : i64, tpu.core_type = #tpu.core_type<tc>, window_params = [{transform_indices = @transform_0, window_bounds = array<i64: 1, 4, 256>}, {pipeline_mode = #tpu.pipeline_mode<synchronous>, transform_indices = @transform_1, window_bounds = array<i64: 4, 2>}, {pipeline_mode = #tpu.pipeline_mode<synchronous>, transform_indices = @transform_2, window_bounds = array<i64: 2, 4>}, {pipeline_mode = #tpu.pipeline_mode<synchronous>, transform_indices = @transform_3, window_bounds = array<i64: 1, 2>}, {pipeline_mode = #tpu.pipeline_mode<synchronous>, transform_indices = @transform_4, window_bounds = array<i64: 1, 4>}, {transform_indices = @transform_5, window_bounds = array<i64: 1, 4, 256>}]} {
    %c0 = arith.constant 0 : index
    %c0_0 = arith.constant 0 : index
    %c0_1 = arith.constant 0 : index
    %0 = vector.load %arg1[%c0, %c0_0, %c0_1] : memref<1x4x256xf32, #tpu.memory_space<vmem>>, vector<1x4x256xf32>
    %cst = arith.constant dense<0.000000e+00> : vector<1x4xf32>
    %1 = vector.multi_reduction <add>, %0, %cst [2] : vector<1x4x256xf32> to vector<1x4xf32>
    %cst_2 = arith.constant 3.906250e-03 : f32
    %2 = vector.broadcast %cst_2 : f32 to vector<1x4xf32>
    %3 = arith.mulf %1, %2 : vector<1x4xf32>
    %c0_3 = arith.constant 0 : index
    %c0_4 = arith.constant 0 : index
    %4 = vector.load %arg2[%c0_3, %c0_4] : memref<4x2xf32, #tpu.memory_space<vmem>>, vector<4x2xf32>
    %cst_5 = arith.constant dense<0.000000e+00> : vector<1x2xf32>
    %5 = tpu.matmul %3, %4, %cst_5 {dimension_numbers = #tpu.dot_dimension_numbers<[1], [0], [0], [1], [0, 0, 1, 1], [], []>} : vector<1x4xf32>, vector<4x2xf32>, vector<1x2xf32> -> vector<1x2xf32>
    %c0_6 = arith.constant 0 : index
    %c0_7 = arith.constant 0 : index
    %6 = vector.load %arg4[%c0_6, %c0_7] : memref<1x2xf32, #tpu.memory_space<vmem>>, vector<1x2xf32>
    %7 = arith.addf %5, %6 : vector<1x2xf32>
    %cst_8 = arith.constant 0.000000e+00 : f32
    %8 = vector.broadcast %cst_8 : f32 to vector<1x2xf32>
    %9 = arith.maximumf %7, %8 : vector<1x2xf32>
    %c0_9 = arith.constant 0 : index
    %c0_10 = arith.constant 0 : index
    %10 = vector.load %arg3[%c0_9, %c0_10] : memref<2x4xf32, #tpu.memory_space<vmem>>, vector<2x4xf32>
    %cst_11 = arith.constant dense<0.000000e+00> : vector<1x4xf32>
    %11 = tpu.matmul %9, %10, %cst_11 {dimension_numbers = #tpu.dot_dimension_numbers<[1], [0], [0], [1], [0, 0, 1, 1], [], []>} : vector<1x2xf32>, vector<2x4xf32>, vector<1x4xf32> -> vector<1x4xf32>
    %c0_12 = arith.constant 0 : index
    %c0_13 = arith.constant 0 : index
    %12 = vector.load %arg5[%c0_12, %c0_13] : memref<1x4xf32, #tpu.memory_space<vmem>>, vector<1x4xf32>
    %13 = arith.addf %11, %12 : vector<1x4xf32>
    %14 = arith.negf %13 : vector<1x4xf32>
    %15 = math.exp %14 : vector<1x4xf32>
    %cst_14 = arith.constant 1.000000e+00 : f32
    %16 = vector.broadcast %cst_14 : f32 to vector<1x4xf32>
    %17 = arith.addf %16, %15 : vector<1x4xf32>
    %18 = arith.divf %16, %17 : vector<1x4xf32>
    %c0_15 = arith.constant 0 : index
    %c0_16 = arith.constant 0 : index
    %c0_17 = arith.constant 0 : index
    %19 = vector.load %arg1[%c0_15, %c0_16, %c0_17] : memref<1x4x256xf32, #tpu.memory_space<vmem>>, vector<1x4x256xf32>
    %20 = vector.shape_cast %18 : vector<1x4xf32> to vector<1x4x1xf32>
    %21 = vector.broadcast %20 : vector<1x4x1xf32> to vector<1x4x256xf32>
    %22 = arith.mulf %19, %21 : vector<1x4x256xf32>
    %c0_18 = arith.constant 0 : index
    %c0_19 = arith.constant 0 : index
    %c0_20 = arith.constant 0 : index
    %23 = vector.load %arg6[%c0_18, %c0_19, %c0_20] : memref<1x4x256xf32, #tpu.memory_space<vmem>>, vector<1x4x256xf32>
    tpu.vector_store %arg6[%c0_18, %c0_19, %c0_20], %22 {strides = array<i32>} : memref<1x4x256xf32, #tpu.memory_space<vmem>>, vector<1x4x256xf32>,
    return
  }
  func.func @transform_0(%arg0: i32) -> (i32, i32, i32) {
    %c0_i32 = arith.constant 0 : i32
    %c0_i32_0 = arith.constant 0 : i32
    %c0_i32_1 = arith.constant 0 : i32
    return %arg0, %c0_i32, %c0_i32_0 : i32, i32, i32
  }
  func.func @transform_1(%arg0: i32) -> (i32, i32) {
    %c0_i32 = arith.constant 0 : i32
    %c0_i32_0 = arith.constant 0 : i32
    %c0_i32_1 = arith.constant 0 : i32
    return %c0_i32, %c0_i32_0 : i32, i32
  }
  func.func @transform_2(%arg0: i32) -> (i32, i32) {
    %c0_i32 = arith.constant 0 : i32
    %c0_i32_0 = arith.constant 0 : i32
    %c0_i32_1 = arith.constant 0 : i32
    return %c0_i32, %c0_i32_0 : i32, i32
  }
  func.func @transform_3(%arg0: i32) -> (i32, i32) {
    %c0_i32 = arith.constant 0 : i32
    %c0_i32_0 = arith.constant 0 : i32
    %c0_i32_1 = arith.constant 0 : i32
    return %c0_i32, %c0_i32_0 : i32, i32
  }
  func.func @transform_4(%arg0: i32) -> (i32, i32) {
    %c0_i32 = arith.constant 0 : i32
    %c0_i32_0 = arith.constant 0 : i32
    %c0_i32_1 = arith.constant 0 : i32
    return %c0_i32, %c0_i32_0 : i32, i32
  }
  func.func @transform_5(%arg0: i32) -> (i32, i32, i32) {
    %c0_i32 = arith.constant 0 : i32
    %c0_i32_0 = arith.constant 0 : i32
    %c0_i32_1 = arith.constant 0 : i32
    return %arg0, %c0_i32, %c0_i32_0 : i32, i32, i32
  }
}

</mosaic_0001>

<bundles_post_ra>
// kernel: se_module.1
= control target key start
LH: loop header
LB: loop body
LE: loop exit
PB: predicated region body
PF: predicated region fallthrough
CT: control target
= control target key end

     0   :  { %s462_s18 = smov 0   ;;  %s498_s0 = inlined_call_operand.vmem [shape: f32[2,4,256], index: 0, kind: input, shape index: {}]   ;;  %s499_s1 = inlined_call_operand.vmem [shape: f32[4,2], index: 1, kind: input, shape index: {}]   ;;  %s500_s2 = inlined_call_operand.vmem [shape: f32[2,4], index: 2, kind: input, shape index: {}]   ;;  %s501_s3 = inlined_call_operand.vmem [shape: f32[1,2], index: 3, kind: input, shape index: {}]   ;;  %s502_s4 = inlined_call_operand.vmem [shape: f32[1,4], index: 4, kind: input, shape index: {}]   ;;  %s503_s5 = inlined_call_operand.vmem [shape: f32[2,4,256], index: 5, kind: output, shape index: {}]  }
   0x1 LB: > { %s391_s19 = sadd.s32 4294967295, %s429_s18   ;;  %p395_p0 = scmp.ge.s32.totalorder %s429_s18, 1  ;;  %s429_s18 = sphi %s462_s18, %s15_s18  }
   0x2   : > { %p187_p1 = scmp.lt.s32.totalorder %s429_s18, 3 }
   0x4   : > { %p188_p2 = pnand %p395_p0, %p187_p1 }
   0x5   : > { %p215_p3 = scmp.lt.s32.totalorder (!%p188_p2), %s391_s19, 1 }
   0x6   : > { %191 = sbr.rel (%p188_p2) target bundleno = 554 (0x22a), region = 40 }
   0xb   : > { %s505_s19 = smov (!%p215_p3, %s391_s19), 1  ;;  %vm232_vm0 = vcmask 1043456   ;;  %v239_v6 = vld [vmem:[%s499_s1] sm:$0xf]  ;;  %v242_v7 = vlaneseq  ;;  %vm245_vm1 = vcmask 31744   ;;  %vm278_vm2 = vcmask 1041408  }
   0xc   : > { %s407_s20 = sshll.u32 %s505_s19, 3  ;;  %400 = vmatpush.msk.msra.mxu0 %vm232_vm0, %v239_v6  ;;  %v272_v12 = vld [vmem:[%s500_s2] sm:$0x3]  ;;  %vm274_vm3 = vcmask 15360   ;;  %v431_v35 = vmov 839922192  }
   0xd   : > { %s219_s23 = scalar_lea.vmem %s498_s0, %s407_s20  ;;  %v243_v8 = vand.u32 127, %v242_v7  ;;  %402 = vmatpush.msk.msra.mxu1 %vm278_vm2, %v272_v12  ;;  %v240_v13 = vld [vmem:[%s501_s3] sm:$0x1]  ;;  %v323_v17 = vshrl.u32 %v242_v7, 7  ;;  %v330_v36 = vunpack.c.l.s4 %v431_v35  ;;  %s224_s9 = scalar_lea.vmem %s503_s5, %s407_s20 }
   0xe   : > { %v225_v0 = vld [vmem:[%s219_s23] sm:$0xff] }
   0xf   : > { %227 = vst [vmem:[#allocation1] ss:$2 sm:$0xff] %v225_v0  ;;  %418 = vset.pattern.permute.xlu0 %v323_v17  ;;  %v273_v18 = vld [vmem:[%s502_s4] sm:$0x1]  ;;  %v331_v37 = vunpack.c.0.s8 %v330_v36 }
  0x16   : > { %v228_v1 = vld.sshfl [vmem:[#allocation1] sm:$0xff pattern:$0x75316420]  ;;  %v229_v2 = vld.sshfl [vmem:[#allocation1 + $0x8] sm:$0xff pattern:$0x75316420] }
  0x17   : > { %v233_v3 = vsel %vm232_vm0, %v228_v1, 0.0  ;;  %v234_v4 = vsel %vm232_vm0, %v229_v2, 0.0 }
  0x18   : > { %v235_v5 = vadd.f32 %v234_v4, %v233_v3 }
  0x1a   : > { %236 = vadd.xlane.f32.xlu0 %v235_v5 }
  0x8d   : > { %v237_v9 = vpop.xlane.xlu0 %236 }
  0x8e   : > { %v238_v10 = vmul.f32 0.00390625, %v237_v9 }
  0x90   : > { %v244_v11 = vperm.slane %v238_v10, %v243_v8 }
  0x92   : > { %401 = vmatmul.msk.f32.vlgmr.msra.gmra.mxu0 %vm245_vm1, %v244_v11 }
 0x10f   : > { %v268_v14 = vpop.f32.mrf.mxu0 }
 0x110   : > { %v269_v15 = vadd.f32 %v268_v14, %v240_v13 }
 0x112   : > { %v271_v16 = vmax.f32 %v269_v15, 0.0 }
 0x114   : > { %403 = vmatmul.msk.f32.vlgmr.msra.gmra.mxu1 %vm274_vm3, %v271_v16 }
 0x191   : > { %v299_v19 = vpop.f32.mrf.mxu1 }
 0x192   : > { %v300_v20 = vadd.f32 %v299_v19, %v273_v18 }
 0x194   : > { %v404_v21 = vmul.f32 -1.442695, %v300_v20 }
 0x196   : > { %419 = vpow2.f32 %v404_v21 }
 0x19c   : > { %v420_v22 = vpop.eup %419 }
 0x19d   : > { %v305_v23 = vadd.f32 1.0, %v420_v22 }
 0x19f   : > { %421 = vrcp.f32 %v305_v23  ;;  %v317_v27 = vand.u32 2147483648, %v305_v23  ;;  %v315_v29 = vand.u32 2147483647, %v305_v23  ;;  %vm311_vm5 = vweird.f32 %v305_v23 }
 0x1a1   : > { %v318_v31 = vor.u32 1.1754944e-38, %v317_v27  ;;  %vm316_vm7 = vcmp.eq.f32.partialorder %v315_v29, 8.507059e+37 }
 0x1a5   : > { %v422_v24 = vpop.eup %421 }
 0x1a6   : > { %v307_v25 = vmul.f32 %v422_v24, %v305_v23  ;;  %vm312_vm4 = vweird.f32 %v422_v24 }
 0x1a7   : > { %vm313_vm6 = vmor %vm311_vm5, %vm312_vm4 }
 0x1a8   : > { %v308_v26 = vsub.f32 1.0, %v307_v25 }
 0x1aa   : > { %v309_v28 = vmul.f32 %v422_v24, %v308_v26 }
 0x1ac   : > { %v310_v30 = vadd.f32 %v422_v24, %v309_v28 }
 0x1ae   : > { %v314_v32 = vsel %vm313_vm6, %v422_v24, %v310_v30 }
 0x1af   : > { %v319_v33 = vsel %vm316_vm7, %v318_v31, %v314_v32 }
 0x1b0   : > { %v321_v34 = vperm.slane %v319_v33, 0 }
 0x1b2   : > { %326 = vperm.xlu0 %418, %v321_v34  }
 0x224   : > { %v327_v38 = vpop.permute.xlu0 %326 }
 0x225   : > { %v332_v39 = vperm.slane %v327_v38, %v331_v37 }
 0x227   : > { %v334_v40 = vmul.f32 %v332_v39, %v225_v0 }
 0x229   : > { %335 = vst [vmem:[%s224_s9] sm:$0xff] %v334_v40 }
 0x22a PF: > { %s15_s18 = sadd.s32 1, %s429_s18  }
 0x22b   : > { %p12_p4 = scmp.ge.s32.totalorder %s15_s18, 4  }
 0x22d   :  { %14 = sbr.rel (!%p12_p4) target bundleno = 1 (0x1), region = 70 }

</bundles_post_ra>
